<compile_context>
chip_gen: v7x
topology: tpu7x:2x2x1
jax: 0.10.0
libtpu: 0.0.40
codegen_flags: <defaults>
</compile_context>

<pallas_src>
import functools
import math

import jax
import jax.numpy as jnp
from jax.experimental import pallas as pl
from jax.experimental.pallas import tpu as pltpu

EPS = 1e-5  # nn.InstanceNorm3d default


def _round_up(x, m):
    return -(-x // m) * m


def _vmem_budget_bytes():
    """Per-generation scoped-VMEM budget (<= ~48 MiB on v7x, ~96-100 MiB on v5e/v6e)."""
    try:
        cap = int(pltpu.get_tpu_info().vmem_capacity_bytes)
    except Exception:
        cap = 64 << 20  # conservative (v7x-sized) fallback
    return min(cap * 3 // 4, 100 << 20)


def _choose_tiles(rows, spatial, itemsize, n_tile_streams=3, max_ts=8192):
    """Pick (TR, TS, vmem_limit): TR multiple of 8, TS multiple of 128, block sized so
    n double-buffered tile streams fit the per-generation VMEM budget; TR capped so the
    row ('parallel') grid axis has >= 2 blocks whenever possible (v7x megacore)."""
    budget = _vmem_budget_bytes()
    blk = budget // (2 * n_tile_streams + 2)
    blk = max(1 << 20, min(8 << 20, blk))
    ts = min(_round_up(spatial, 128), max_ts,
             max(128, (blk // (8 * itemsize)) // 128 * 128))
    tr = max(8, (blk // (ts * itemsize)) // 8 * 8)
    r8 = _round_up(rows, 8)
    tr = min(tr, r8)
    if r8 >= 16:  # guarantee >= 2 row blocks so both TensorCores get work on v7x
        tr = min(tr, max(8, (r8 // 2) // 8 * 8))
    return tr, ts, budget


# ---------------------------------------------------------------------------
# Pass 1: per-row (per (B, C) instance) sum and sum-of-squares of relu(y + bias).
# ---------------------------------------------------------------------------
def _stats_kernel(y_ref, bias_ref, sum_ref, sumsq_ref):
    @pl.when(pl.program_id(1) == 0)
    def _():
        sum_ref[...] = jnp.zeros_like(sum_ref)
        sumsq_ref[...] = jnp.zeros_like(sumsq_ref)

    y = jnp.maximum(y_ref[...].astype(jnp.float32) + bias_ref[...], 0.0)
    sum_ref[...] += jnp.sum(y, axis=-1, keepdims=True)
    sumsq_ref[...] += jnp.sum(y * y, axis=-1, keepdims=True)


def _stats_kernel_ragged(y_ref, bias_ref, sum_ref, sumsq_ref, *, rem):
    """Same as _stats_kernel but lane-masks the ragged last spatial block only."""
    j = pl.program_id(1)
    last = pl.num_programs(1) - 1

    @pl.when(j == 0)
    def _():
        sum_ref[...] = jnp.zeros_like(sum_ref)
        sumsq_ref[...] = jnp.zeros_like(sumsq_ref)

    y = jnp.maximum(y_ref[...].astype(jnp.float32) + bias_ref[...], 0.0)

    @pl.when(j < last)
    def _():
        sum_ref[...] += jnp.sum(y, axis=-1, keepdims=True)
        sumsq_ref[...] += jnp.sum(y * y, axis=-1, keepdims=True)

    @pl.when(j == last)
    def _():
        lane = jax.lax.broadcasted_iota(jnp.int32, y.shape, 1)
        ym = jnp.where(lane < rem, y, 0.0)
        sum_ref[...] += jnp.sum(ym, axis=-1, keepdims=True)
        sumsq_ref[...] += jnp.sum(ym * ym, axis=-1, keepdims=True)


# ---------------------------------------------------------------------------
# Pass 2: per-row coefficients packed as coef[0]=conv bias, coef[1]=a, coef[2]=b.
#   o = relu(y + bias)*a + b  [+ residual],  residual either raw x or the fused
#   res-branch relu(y_res + bias_r)*a_r + b_r.
# ---------------------------------------------------------------------------
def _apply_identity_res_kernel(y_ref, coef_ref, r_ref, o_ref):
    y = jnp.maximum(y_ref[...].astype(jnp.float32) + coef_ref[0], 0.0)
    o_ref[...] = (y * coef_ref[1] + coef_ref[2]
                  + r_ref[...].astype(jnp.float32)).astype(o_ref.dtype)


def _apply_fused_res_kernel(y_ref, coef_ref, yr_ref, coefr_ref, o_ref):
    y = jnp.maximum(y_ref[...].astype(jnp.float32) + coef_ref[0], 0.0)
    yr = jnp.maximum(yr_ref[...].astype(jnp.float32) + coefr_ref[0], 0.0)
    o_ref[...] = (y * coef_ref[1] + coef_ref[2]
                  + yr * coefr_ref[1] + coefr_ref[2]).astype(o_ref.dtype)


# ---------------------------------------------------------------------------
# Stats pass + SE MLP + InstanceNorm fold  ->  (3, R, 1) per-row coefficients.
# ---------------------------------------------------------------------------
def _se_fold_coeffs(y2, bias_rows, se, batch, channels, spatial, TR, TS, vmem_limit):
    rows = batch * channels
    grid = (pl.cdiv(rows, TR), pl.cdiv(spatial, TS))
    rem = spatial - (grid[1] - 1) * TS
    kernel = (_stats_kernel if rem == TS
              else functools.partial(_stats_kernel_ragged, rem=rem))

    tile_spec = pl.BlockSpec((TR, TS), lambda i, j: (i, j))
    row_spec = pl.BlockSpec((TR, 1), lambda i, j: (i, 0))

    sums, sumsqs = pl.pallas_call(
        kernel,
        out_shape=(jax.ShapeDtypeStruct((rows, 1), jnp.float32),
                   jax.ShapeDtypeStruct((rows, 1), jnp.float32)),
        grid_spec=pltpu.PrefetchScalarGridSpec(
            num_scalar_prefetch=0,
            grid=grid,
            in_specs=[tile_spec, row_spec],
            out_specs=(row_spec, row_spec)),
        compiler_params=pltpu.CompilerParams(
            dimension_semantics=("parallel", "arbitrary"),
            vmem_limit_bytes=vmem_limit),
    )(y2, bias_rows)

    inv_s = 1.0 / float(spatial)
    mean = (sums[:, 0] * inv_s).reshape(batch, channels)
    ex2 = (sumsqs[:, 0] * inv_s).reshape(batch, channels)
    var = jnp.maximum(ex2 - mean * mean, 0.0)  # guard f32 cancellation

    def branch(w1, b1, w2, b2):
        h = jax.nn.relu(mean @ w1.T + b1)  # (B,C)@(C,Cr): proper MXU shape
        return h @ w2.T + b2

    gamma = jax.nn.sigmoid(branch(*se["gamma"]))
    beta = jnp.tanh(branch(*se["beta"]))
    a = gamma * jax.lax.rsqrt(var + EPS)     # per-row scale
    b = beta - a * mean                      # per-row shift

    coef = jnp.stack([bias_rows.reshape(rows),
                      a.reshape(rows).astype(jnp.float32),
                      b.reshape(rows).astype(jnp.float32)], axis=0)
    return coef.reshape(3, rows, 1)


# ---------------------------------------------------------------------------
# Module-level forward (mirrors RESseNormConv3d).
# ---------------------------------------------------------------------------
def conv3d(x, w, b, stride, padding):
    # TODO(synk): general Conv3d (kernel_size > 1) has no clean Pallas equivalent here;
    # it stays in XLA while the Pallas kernels fuse the downstream bias/ReLU/norm/gate/skip.
    dn = jax.lax.conv_dimension_numbers(x.shape, w.shape, ("NCDHW", "OIDHW", "NCDHW"))
    out = jax.lax.conv_general_dilated(
        x, w, window_strides=(stride,) * 3, padding=[(padding, padding)] * 3,
        dimension_numbers=dn)
    if b is not None:
        out = out + b.reshape(1, -1, 1, 1, 1)
    return out


def _bias_rows(conv_b, batch, channels):
    return jnp.broadcast_to(conv_b.astype(jnp.float32)[None, :],
                            (batch, channels)).reshape(batch * channels, 1)


def res_se_norm_conv3d(x, params):
    """RESseNormConv3d forward: conv1-branch SE-norm plus fused skip connection."""
    p1 = params["conv1"]
    y1 = conv3d(x, p1["conv_w"], None, p1["stride"], p1["padding"])  # bias folded in-kernel
    B, C, D, H, W = y1.shape
    S = D * H * W
    R = B * C
    dt = y1.dtype
    itemsize = jnp.dtype(dt).itemsize

    TR, TS, vmem_limit = _choose_tiles(R, S, itemsize, n_tile_streams=3)
    grid = (pl.cdiv(R, TR), pl.cdiv(S, TS))
    tile_spec = pl.BlockSpec((TR, TS), lambda i, j: (i, j))
    coef_spec = pl.BlockSpec((3, TR, 1), lambda i, j: (0, i, 0))

    y1_2 = y1.reshape(R, S)
    bias1 = _bias_rows(p1["conv_b"], B, C)
    coef1 = _se_fold_coeffs(y1_2, bias1, p1["se"], B, C, S, TR, TS, vmem_limit)

    if params["res"] is not None:
        pr = params["res"]
        yr2 = conv3d(x, pr["conv_w"], None, pr["stride"], pr["padding"]).reshape(R, S)
        biasr = _bias_rows(pr["conv_b"], B, C)
        coefr = _se_fold_coeffs(yr2, biasr, pr["se"], B, C, S, TR, TS, vmem_limit)
        kernel = _apply_fused_res_kernel
        ins = (y1_2, coef1, yr2, coefr)
        in_specs = [tile_spec, coef_spec, tile_spec, coef_spec]
    else:
        kernel = _apply_identity_res_kernel
        ins = (y1_2, coef1, x.reshape(R, S))
        in_specs = [tile_spec, coef_spec, tile_spec]

    out2 = pl.pallas_call(
        kernel,
        out_shape=jax.ShapeDtypeStruct((R, S), dt),
        grid_spec=pltpu.PrefetchScalarGridSpec(
            num_scalar_prefetch=0,
            grid=grid,
            in_specs=in_specs,
            out_specs=tile_spec),
        compiler_params=pltpu.CompilerParams(
            dimension_semantics=("parallel", "parallel"),
            vmem_limit_bytes=vmem_limit),
        input_output_aliases={0: 0},  # reuse the conv-output buffer for the result
    )(*ins)

    return out2.reshape(B, C, D, H, W)


# ---------------------------------------------------------------------------
# Deterministic synthetic parameters + pure-JAX reference.
# ---------------------------------------------------------------------------
def _make_fssnc_params(key, cin, cout, reduction, kernel_size, stride, padding):
    ks = jax.random.split(key, 10)
    fan_in = cin * kernel_size ** 3
    conv_w = jax.random.normal(
        ks[0], (cout, cin, kernel_size, kernel_size, kernel_size), jnp.float32
    ) / math.sqrt(fan_in)
    conv_b = 0.1 * jax.random.normal(ks[1], (cout,), jnp.float32)
    cr = max(1, cout // reduction)

    def se_branch(k0, k1, k2, k3):
        w1 = 0.5 * jax.random.normal(k0, (cr, cout), jnp.float32)
        b1 = 0.5 * jax.random.normal(k1, (cr,), jnp.float32)
        w2 = 0.5 * jax.random.normal(k2, (cout, cr), jnp.float32)
        b2 = 0.5 * jax.random.normal(k3, (cout,), jnp.float32)
        return (w1, b1, w2, b2)

    return dict(conv_w=conv_w, conv_b=conv_b, stride=stride, padding=padding,
                se={"gamma": se_branch(*ks[2:6]), "beta": se_branch(*ks[6:10])})


def make_params(key, in_channels, out_channels, reduction=2,
                kernel_size=3, stride=1, padding=1):
    k1, k2 = jax.random.split(key)
    conv1 = _make_fssnc_params(k1, in_channels, out_channels, reduction,
                               kernel_size, stride, padding)
    res = (_make_fssnc_params(k2, in_channels, out_channels, reduction, 1, 1, 0)
           if in_channels != out_channels else None)
    return {"conv1": conv1, "res": res}


def reference_forward(x, params):
    """Pure-JAX/XLA reference mirroring the PyTorch RESseNormConv3d semantics."""
    def se_norm_ref(y, se):
        b_, c_ = y.shape[:2]
        pooled = y.reshape(b_, c_, -1).mean(-1)

        def branch(w1, b1, w2, b2):
            h = jax.nn.relu(pooled @ w1.T + b1)
            return h @ w2.T + b2

        gamma = jax.nn.sigmoid(branch(*se["gamma"]))[:, :, None, None, None]
        beta = jnp.tanh(branch(*se["beta"]))[:, :, None, None, None]
        mean = y.mean(axis=(2, 3, 4), keepdims=True)
        var = ((y - mean) ** 2).mean(axis=(2, 3, 4), keepdims=True)
        return gamma * ((y - mean) * jax.lax.rsqrt(var + EPS)) + beta

    def fssnc_ref(xin, p):
        y = jax.nn.relu(conv3d(xin, p["conv_w"], p["conv_b"], p["stride"], p["padding"]))
        return se_norm_ref(y, p["se"])

    residual = fssnc_ref(x, params["res"]) if params["res"] is not None else x
    return fssnc_ref(x, params["conv1"]) + residual


if __name__ == "__main__":
    key = jax.random.PRNGKey(0)

    configs = [
        # (B, C_in, C_out, D, H, W): first exercises the fused res_conv branch,
        # second exercises the identity-skip path plus ragged row/lane tiles.
        (2, 4, 8, 8, 8, 8),
        (3, 6, 6, 7, 7, 7),
    ]

    for idx, (B, C_in, C_out, D, H, W) in enumerate(configs):
        key, k_x, k_p = jax.random.split(key, 3)
        x = jax.random.normal(k_x, (B, C_in, D, H, W), jnp.float32)
        params = make_params(k_p, C_in, C_out, reduction=2,
                             kernel_size=3, stride=1, padding=1)

        fwd = jax.jit(functools.partial(res_se_norm_conv3d, params=params))
        out = jax.block_until_ready(fwd(x))

        ref = reference_forward(x, params)
        assert out.shape == (B, C_out, D, H, W)
        err = float(jnp.max(jnp.abs(out - ref)))
        assert jnp.allclose(out, ref, atol=1e-4, rtol=1e-4), \
            f"config {idx}: mismatch vs reference, max abs err {err}"

    print("KERNEL_OK")
</pallas_src>

<mosaic_0001>
module attributes {stable_mosaic.version = 11 : i64} {
  func.func @_stats_kernel(%arg0: i32, %arg1: i32, %arg2: memref<8x512xf32, #tpu.memory_space<vmem>>, %arg3: memref<8x1xf32, #tpu.memory_space<vmem>>, %arg4: memref<8x1xf32, #tpu.memory_space<vmem>>, %arg5: memref<8x1xf32, #tpu.memory_space<vmem>>) attributes {dimension_semantics = [#tpu.dimension_semantics<parallel>, #tpu.dimension_semantics<arbitrary>], iteration_bounds = array<i64: 2, 1>, scalar_prefetch = 0 : i64, scratch_operands = 0 : i64, tpu.core_type = #tpu.core_type<tc>, window_params = [{transform_indices = @transform_0, window_bounds = array<i64: 8, 512>}, {transform_indices = @transform_1, window_bounds = array<i64: 8, 1>}, {transform_indices = @transform_2, window_bounds = array<i64: 8, 1>}, {transform_indices = @transform_3, window_bounds = array<i64: 8, 1>}]} {
    %c0_i32 = arith.constant 0 : i32
    %0 = arith.cmpi eq, %arg1, %c0_i32 : i32
    %1 = arith.extui %0 : i1 to i32
    %c0_i32_0 = arith.constant 0 : i32
    %2 = arith.cmpi ne, %1, %c0_i32_0 : i32
    scf.if %2 {
      %cst_14 = arith.constant 0.000000e+00 : f32
      %20 = vector.broadcast %cst_14 : f32 to vector<8x1xf32>
      %c0_15 = arith.constant 0 : index
      %c0_16 = arith.constant 0 : index
      %21 = vector.load %arg4[%c0_15, %c0_16] : memref<8x1xf32, #tpu.memory_space<vmem>>, vector<8x1xf32>
      tpu.vector_store %arg4[%c0_15, %c0_16], %20 {strides = array<i32>} : memref<8x1xf32, #tpu.memory_space<vmem>>, vector<8x1xf32>,
      %cst_17 = arith.constant 0.000000e+00 : f32
      %22 = vector.broadcast %cst_17 : f32 to vector<8x1xf32>
      %c0_18 = arith.constant 0 : index
      %c0_19 = arith.constant 0 : index
      %23 = vector.load %arg5[%c0_18, %c0_19] : memref<8x1xf32, #tpu.memory_space<vmem>>, vector<8x1xf32>
      tpu.vector_store %arg5[%c0_18, %c0_19], %22 {strides = array<i32>} : memref<8x1xf32, #tpu.memory_space<vmem>>, vector<8x1xf32>,
    } else {
    }
    %c0 = arith.constant 0 : index
    %c0_1 = arith.constant 0 : index
    %3 = vector.load %arg2[%c0, %c0_1] : memref<8x512xf32, #tpu.memory_space<vmem>>, vector<8x512xf32>
    %c0_2 = arith.constant 0 : index
    %c0_3 = arith.constant 0 : index
    %4 = vector.load %arg3[%c0_2, %c0_3] : memref<8x1xf32, #tpu.memory_space<vmem>>, vector<8x1xf32>
    %5 = vector.broadcast %4 : vector<8x1xf32> to vector<8x512xf32>
    %6 = arith.addf %3, %5 : vector<8x512xf32>
    %cst = arith.constant 0.000000e+00 : f32
    %7 = vector.broadcast %cst : f32 to vector<8x512xf32>
    %8 = arith.maximumf %6, %7 : vector<8x512xf32>
    %c0_4 = arith.constant 0 : index
    %c0_5 = arith.constant 0 : index
    %9 = vector.load %arg4[%c0_4, %c0_5] : memref<8x1xf32, #tpu.memory_space<vmem>>, vector<8x1xf32>
    %cst_6 = arith.constant dense<0.000000e+00> : vector<8xf32>
    %10 = vector.multi_reduction <add>, %8, %cst_6 [1] : vector<8x512xf32> to vector<8xf32>
    %11 = vector.shape_cast %10 : vector<8xf32> to vector<8x1xf32>
    %12 = arith.addf %9, %11 : vector<8x1xf32>
    %c0_7 = arith.constant 0 : index
    %c0_8 = arith.constant 0 : index
    %13 = vector.load %arg4[%c0_7, %c0_8] : memref<8x1xf32, #tpu.memory_space<vmem>>, vector<8x1xf32>
    tpu.vector_store %arg4[%c0_7, %c0_8], %12 {strides = array<i32>} : memref<8x1xf32, #tpu.memory_space<vmem>>, vector<8x1xf32>,
    %c0_9 = arith.constant 0 : index
    %c0_10 = arith.constant 0 : index
    %14 = vector.load %arg5[%c0_9, %c0_10] : memref<8x1xf32, #tpu.memory_space<vmem>>, vector<8x1xf32>
    %15 = arith.mulf %8, %8 : vector<8x512xf32>
    %cst_11 = arith.constant dense<0.000000e+00> : vector<8xf32>
    %16 = vector.multi_reduction <add>, %15, %cst_11 [1] : vector<8x512xf32> to vector<8xf32>
    %17 = vector.shape_cast %16 : vector<8xf32> to vector<8x1xf32>
    %18 = arith.addf %14, %17 : vector<8x1xf32>
    %c0_12 = arith.constant 0 : index
    %c0_13 = arith.constant 0 : index
    %19 = vector.load %arg5[%c0_12, %c0_13] : memref<8x1xf32, #tpu.memory_space<vmem>>, vector<8x1xf32>
    tpu.vector_store %arg5[%c0_12, %c0_13], %18 {strides = array<i32>} : memref<8x1xf32, #tpu.memory_space<vmem>>, vector<8x1xf32>,
    return
  }
  func.func @transform_0(%arg0: i32, %arg1: i32) -> (i32, i32) {
    %c0_i32 = arith.constant 0 : i32
    return %arg0, %arg1 : i32, i32
  }
  func.func @transform_1(%arg0: i32, %arg1: i32) -> (i32, i32) {
    %c0_i32 = arith.constant 0 : i32
    %c0_i32_0 = arith.constant 0 : i32
    return %arg0, %c0_i32 : i32, i32
  }
  func.func @transform_2(%arg0: i32, %arg1: i32) -> (i32, i32) {
    %c0_i32 = arith.constant 0 : i32
    %c0_i32_0 = arith.constant 0 : i32
    return %arg0, %c0_i32 : i32, i32
  }
  func.func @transform_3(%arg0: i32, %arg1: i32) -> (i32, i32) {
    %c0_i32 = arith.constant 0 : i32
    %c0_i32_0 = arith.constant 0 : i32
    return %arg0, %c0_i32 : i32, i32
  }
}

module attributes {stable_mosaic.version = 11 : i64} {
  func.func @_apply_fused_res_kernel(%arg0: i32, %arg1: i32, %arg2: memref<8x512xf32, #tpu.memory_space<vmem>>, %arg3: memref<3x8x1xf32, #tpu.memory_space<vmem>>, %arg4: memref<8x512xf32, #tpu.memory_space<vmem>>, %arg5: memref<3x8x1xf32, #tpu.memory_space<vmem>>, %arg6: memref<8x512xf32, #tpu.memory_space<vmem>>) attributes {dimension_semantics = [#tpu.dimension_semantics<parallel>, #tpu.dimension_semantics<parallel>], iteration_bounds = array<i64: 2, 1>, scalar_prefetch = 0 : i64, scratch_operands = 0 : i64, tpu.core_type = #tpu.core_type<tc>, window_params = [{transform_indices = @transform_0, window_bounds = array<i64: 8, 512>}, {transform_indices = @transform_1, window_bounds = array<i64: 3, 8, 1>}, {transform_indices = @transform_2, window_bounds = array<i64: 8, 512>}, {transform_indices = @transform_3, window_bounds = array<i64: 3, 8, 1>}, {transform_indices = @transform_4, window_bounds = array<i64: 8, 512>}]} {
    %c0 = arith.constant 0 : index
    %c0_0 = arith.constant 0 : index
    %0 = vector.load %arg2[%c0, %c0_0] : memref<8x512xf32, #tpu.memory_space<vmem>>, vector<8x512xf32>
    %c0_1 = arith.constant 0 : index
    %c0_2 = arith.constant 0 : index
    %c0_3 = arith.constant 0 : index
    %1 = vector.load %arg3[%c0_1, %c0_2, %c0_3] : memref<3x8x1xf32, #tpu.memory_space<vmem>>, vector<1x8x1xf32>
    %2 = vector.shape_cast %1 : vector<1x8x1xf32> to vector<8x1xf32>
    %3 = vector.broadcast %2 : vector<8x1xf32> to vector<8x512xf32>
    %4 = arith.addf %0, %3 : vector<8x512xf32>
    %cst = arith.constant 0.000000e+00 : f32
    %5 = vector.broadcast %cst : f32 to vector<8x512xf32>
    %6 = arith.maximumf %4, %5 : vector<8x512xf32>
    %c0_4 = arith.constant 0 : index
    %c0_5 = arith.constant 0 : index
    %7 = vector.load %arg4[%c0_4, %c0_5] : memref<8x512xf32, #tpu.memory_space<vmem>>, vector<8x512xf32>
    %c0_6 = arith.constant 0 : index
    %c0_7 = arith.constant 0 : index
    %c0_8 = arith.constant 0 : index
    %8 = vector.load %arg5[%c0_6, %c0_7, %c0_8] : memref<3x8x1xf32, #tpu.memory_space<vmem>>, vector<1x8x1xf32>
    %9 = vector.shape_cast %8 : vector<1x8x1xf32> to vector<8x1xf32>
    %10 = vector.broadcast %9 : vector<8x1xf32> to vector<8x512xf32>
    %11 = arith.addf %7, %10 : vector<8x512xf32>
    %cst_9 = arith.constant 0.000000e+00 : f32
    %12 = vector.broadcast %cst_9 : f32 to vector<8x512xf32>
    %13 = arith.maximumf %11, %12 : vector<8x512xf32>
    %c1 = arith.constant 1 : index
    %c0_10 = arith.constant 0 : index
    %c0_11 = arith.constant 0 : index
    %14 = vector.load %arg3[%c1, %c0_10, %c0_11] : memref<3x8x1xf32, #tpu.memory_space<vmem>>, vector<1x8x1xf32>
    %15 = vector.shape_cast %14 : vector<1x8x1xf32> to vector<8x1xf32>
    %16 = vector.broadcast %15 : vector<8x1xf32> to vector<8x512xf32>
    %17 = arith.mulf %6, %16 : vector<8x512xf32>
    %c2 = arith.constant 2 : index
    %c0_12 = arith.constant 0 : index
    %c0_13 = arith.constant 0 : index
    %18 = vector.load %arg3[%c2, %c0_12, %c0_13] : memref<3x8x1xf32, #tpu.memory_space<vmem>>, vector<1x8x1xf32>
    %19 = vector.shape_cast %18 : vector<1x8x1xf32> to vector<8x1xf32>
    %20 = vector.broadcast %19 : vector<8x1xf32> to vector<8x512xf32>
    %21 = arith.addf %17, %20 : vector<8x512xf32>
    %c1_14 = arith.constant 1 : index
    %c0_15 = arith.constant 0 : index
    %c0_16 = arith.constant 0 : index
    %22 = vector.load %arg5[%c1_14, %c0_15, %c0_16] : memref<3x8x1xf32, #tpu.memory_space<vmem>>, vector<1x8x1xf32>
    %23 = vector.shape_cast %22 : vector<1x8x1xf32> to vector<8x1xf32>
    %24 = vector.broadcast %23 : vector<8x1xf32> to vector<8x512xf32>
    %25 = arith.mulf %13, %24 : vector<8x512xf32>
    %26 = arith.addf %21, %25 : vector<8x512xf32>
    %c2_17 = arith.constant 2 : index
    %c0_18 = arith.constant 0 : index
    %c0_19 = arith.constant 0 : index
    %27 = vector.load %arg5[%c2_17, %c0_18, %c0_19] : memref<3x8x1xf32, #tpu.memory_space<vmem>>, vector<1x8x1xf32>
    %28 = vector.shape_cast %27 : vector<1x8x1xf32> to vector<8x1xf32>
    %29 = vector.broadcast %28 : vector<8x1xf32> to vector<8x512xf32>
    %30 = arith.addf %26, %29 : vector<8x512xf32>
    %c0_20 = arith.constant 0 : index
    %c0_21 = arith.constant 0 : index
    %31 = vector.load %arg6[%c0_20, %c0_21] : memref<8x512xf32, #tpu.memory_space<vmem>>, vector<8x512xf32>
    tpu.vector_store %arg6[%c0_20, %c0_21], %30 {strides = array<i32>} : memref<8x512xf32, #tpu.memory_space<vmem>>, vector<8x512xf32>,
    return
  }
  func.func @transform_0(%arg0: i32, %arg1: i32) -> (i32, i32) {
    %c0_i32 = arith.constant 0 : i32
    return %arg0, %arg1 : i32, i32
  }
  func.func @transform_1(%arg0: i32, %arg1: i32) -> (i32, i32, i32) {
    %c0_i32 = arith.constant 0 : i32
    %c0_i32_0 = arith.constant 0 : i32
    %c0_i32_1 = arith.constant 0 : i32
    return %c0_i32, %arg0, %c0_i32_0 : i32, i32, i32
  }
  func.func @transform_2(%arg0: i32, %arg1: i32) -> (i32, i32) {
    %c0_i32 = arith.constant 0 : i32
    return %arg0, %arg1 : i32, i32
  }
  func.func @transform_3(%arg0: i32, %arg1: i32) -> (i32, i32, i32) {
    %c0_i32 = arith.constant 0 : i32
    %c0_i32_0 = arith.constant 0 : i32
    %c0_i32_1 = arith.constant 0 : i32
    return %c0_i32, %arg0, %c0_i32_0 : i32, i32, i32
  }
  func.func @transform_4(%arg0: i32, %arg1: i32) -> (i32, i32) {
    %c0_i32 = arith.constant 0 : i32
    return %arg0, %arg1 : i32, i32
  }
}

</mosaic_0001>

<bundles_post_ra>
// kernel: res_se_norm_conv3d.4
= control target key start
LH: loop header
LB: loop body
LE: loop exit
PB: predicated region body
PF: predicated region fallthrough
CT: control target
= control target key end

     0   :  { %s467_s12 = smov 0   ;;  %s469_s13 = smov 0   ;;  %s520_s0 = inlined_call_operand.vmem [shape: f32[16,512], index: 0, kind: input, shape index: {}]   ;;  %s521_s1 = inlined_call_operand.vmem [shape: f32[16,1], index: 1, kind: input, shape index: {}]   ;;  %s522_s2 = inlined_call_operand.vmem [shape: f32[16,1], index: 2, kind: output, shape index: {0}]   ;;  %s523_s3 = inlined_call_operand.vmem [shape: f32[16,1], index: 3, kind: output, shape index: {1}]  }
   0x1   :  { %s471_s14 = smov 0  }
   0x2 LB: > { %s26_s15 = sadd.s32 1, %s439_s13  ;;  %p385_p0 = scmp.ge.s32.totalorder %s443_s14, 1  ;;  %s443_s14 = sphi %s471_s14, %s14_s14   ;;  %s439_s13 = sphi %s469_s13, %s525_s13   ;;  %s435_s12 = sphi %s467_s12, %s524_s12  }
   0x3   : > { %p28_p1 = scmp.ge.s32.totalorder %s26_s15, 2  ;;  %p168_p2 = scmp.lt.s32.totalorder %s443_s14, 3 }
   0x5   : > { %s527_s15 = smov (%p28_p1, %s26_s15), 0  ;;  %p169_p3 = pnand %p385_p0, %p168_p2 }
   0x6   : > { %p204_p4 = scmp.lt.s32.totalorder (!%p169_p3), %s435_s12, 1  ;;  %v445_v0 = vmov (!%p169_p3), 0   ;;  %vm229_vm0 = vcmask (!%p169_p3), 7168   ;;  %v446_v2 = vmov (!%p169_p3), 0.0  }
   0x7   : > { %172 = sbr.rel (%p169_p3) target bundleno = 303 (0x12f), region = 28  ;;  %420 = vset.pattern.permute.xlu0 (!%p169_p3), %v445_v0 }
   0xe   : > { %s529_s12 = smov (!%p204_p4, %s435_s12), 1 }
   0xf   : > { %s485_s16 = sshll.u32 %s529_s12, 3  ;;  %s393_s23 = sshll.u32 %s529_s12, 5 }
  0x10   : > { %s216_s19 = scalar_lea.vmem %s521_s1, %s485_s16  ;;  %s495_s22 = scalar_lea.vmem %s522_s2, %s485_s16 }
  0x11   : > { %v236_v1 = vld [vmem:[%s216_s19] sm:$0xff]  ;;  %230 = vst.msk [vmem:[%s495_s22] sm:$0xff] %vm229_vm0, %v446_v2  ;;  %s211_s26 = scalar_lea.vmem %s520_s0, %s393_s23  ;;  %s224_s29 = scalar_lea.vmem %s523_s3, %s485_s16 }
  0x12   : > { %239 = vperm.xlu0 %420, %v236_v1   ;;  %v232_v3 = vld [vmem:[%s211_s26] sm:$0xff]  ;;  %v233_v4 = vld [vmem:[%s211_s26 + $0x8] sm:$0xff]  ;;  %v234_v5 = vld [vmem:[%s211_s26 + $0x10] sm:$0xff]  ;;  %231 = vst.msk [vmem:[%s224_s29] sm:$0xff] %vm229_vm0, %v446_v2 }
  0x13   : > { %v235_v6 = vld [vmem:[%s211_s26 + $0x18] sm:$0xff] }
  0x18   : > { %v250_v26 = vld [vmem:[%s495_s22] sm:$0xff] }
  0x19   : > { %v259_v28 = vld [vmem:[%s224_s29] sm:$0xff] }
  0x91   : > { %v240_v7 = vpop.permute.xlu0 %239 }
  0x92   : > { %v242_v8 = vadd.f32 %v240_v7, %v232_v3  ;;  %v243_v9 = vadd.f32 %v240_v7, %v233_v4  ;;  %v244_v10 = vadd.f32 %v240_v7, %v234_v5  ;;  %v245_v11 = vadd.f32 %v240_v7, %v235_v6 }
  0x94   : > { %v246_v12 = vmax.f32 %v242_v8, 0.0  ;;  %v247_v13 = vmax.f32 %v243_v9, 0.0  ;;  %v248_v14 = vmax.f32 %v244_v10, 0.0  ;;  %v249_v15 = vmax.f32 %v245_v11, 0.0 }
  0x96   : > { %v251_v16 = vadd.f32 %v247_v13, %v246_v12  ;;  %v260_v17 = vmul.f32 %v246_v12, %v246_v12  ;;  %v261_v18 = vmul.f32 %v247_v13, %v247_v13  ;;  %v262_v20 = vmul.f32 %v248_v14, %v248_v14 }
  0x97   : > { %v263_v23 = vmul.f32 %v249_v15, %v249_v15 }
  0x98   : > { %v252_v19 = vadd.f32 %v251_v16, %v248_v14  ;;  %v264_v21 = vadd.f32 %v261_v18, %v260_v17 }
  0x9a   : > { %v253_v22 = vadd.f32 %v252_v19, %v249_v15  ;;  %v265_v24 = vadd.f32 %v264_v21, %v262_v20 }
  0x9c   : > { %254 = vadd.xlane.f32.xlu0 %v253_v22  ;;  %v266_v25 = vadd.f32 %v265_v24, %v263_v23 }
  0x9e   : > { %267 = vadd.xlane.f32.xlu1 %v266_v25 }
 0x129   : > { %v255_v27 = vpop.xlane.xlu0 %254 }
 0x12a   : > { %v256_v29 = vadd.f32 %v255_v27, %v250_v26 }
 0x12b   : > { %v268_v30 = vpop.xlane.xlu1 %267 }
 0x12c   : > { %258 = vst.msk [vmem:[%s495_s22] sm:$0xff] %vm229_vm0, %v256_v29  ;;  %v269_v31 = vadd.f32 %v268_v30, %v259_v28 }
 0x12e   : > { %270 = vst.msk [vmem:[%s224_s29] sm:$0xff] %vm229_vm0, %v269_v31 }
 0x12f PF: > { %s14_s14 = sadd.s32 1, %s443_s14   ;;  %s524_s12 = smov %s439_s13 }
 0x130   : > { %p11_p5 = scmp.ge.s32.totalorder %s14_s14, 4   ;;  %s525_s13 = smov %s527_s15 }
 0x132   :  { %13 = sbr.rel (!%p11_p5) target bundleno = 2 (0x2), region = 77 }

// kernel: res_se_norm_conv3d.5
= control target key start
LH: loop header
LB: loop body
LE: loop exit
PB: predicated region body
PF: predicated region fallthrough
CT: control target
= control target key end

     0   :  { %s760_s15 = smov 0   ;;  %s762_s16 = smov 0   ;;  %s850_s0 = inlined_call_operand.vmem [shape: f32[16,512], index: 0, kind: input, shape index: {}, may-alias: {0,4}]   ;;  %s851_s1 = inlined_call_operand.vmem [shape: f32[3,16,1], index: 1, kind: input, shape index: {}]   ;;  %s852_s2 = inlined_call_operand.vmem [shape: f32[16,512], index: 2, kind: input, shape index: {}]   ;;  %s853_s3 = inlined_call_operand.vmem [shape: f32[3,16,1], index: 3, kind: input, shape index: {}]   ;;  %s854_s4 = inlined_call_operand.vmem [shape: f32[16,512], index: 4, kind: output, shape index: {}, may-alias: {0,4}]  }
   0x1   :  { %s764_s17 = smov 0   ;;  %s766_s18 = smov 0  }
   0x2   :  { %s768_s19 = smov 0  }
   0x3 LB: > { %s26_s20 = sadd.s32 1, %s728_s18  ;;  %p68_p1 = scmp.ne.s32.totalorder %s720_s16, %s716_s15  ;;  %s732_s19 = sphi %s768_s19, %s14_s19   ;;  %s728_s18 = sphi %s766_s18, %s859_s18   ;;  %s724_s17 = sphi %s764_s17, %s858_s17   ;;  %s720_s16 = sphi %s762_s16, %s857_s16   ;;  %s716_s15 = sphi %s760_s15, %s856_s15  }
   0x4   : > { %p28_p0 = scmp.ge.s32.totalorder %s26_s20, 2  ;;  %p69_p2 = scmp.eq.s32.totalorder %s732_s19, 0 }
   0x5   : > { %s61_s23 = sadd.s32 1, %s720_s16  ;;  %p629_p5 = scmp.ge.s32.totalorder %s732_s19, 2 }
   0x6   : > { %s861_s20 = smov (%p28_p0, %s26_s20), 0  ;;  %p791_p3 = por %p69_p2, %p68_p1 }
   0x7   : > { %s58_s22 = ssub.s32 %s728_s18, %s861_s20  ;;  %176 = sbr.rel (%p629_p5) target bundleno = 28 (0x1c), region = 16 }
   0x8   : > { %p59_p4 = scmp.eq.s32.totalorder %s58_s22, 0 }
   0xa   : > { %s799_s24 = scalar_select %p59_p4, %s720_s16, %s61_s23  }
   0xe   : > { %192 = sbr.rel (!%p791_p3) target bundleno = 21 (0x15), region = 24  ;;  %s194_s25 = sand.u32 (%p791_p3), 1, %s720_s16  }
   0xf   : > { %s630_s26 = sshll.u32 (%p791_p3), %s728_s18, 3  ;;  %s648_s27 = smul.u32 (%p791_p3), 24, %s194_s25 }
  0x10   : > { %s198_s30 = scalar_lea.vmem (%p791_p3), %s851_s1, %s630_s26 }
  0x11   : > { %v230_v0 = vld [vmem:[%s198_s30] sm:$0xff] (%p791_p3)  ;;  %v232_v1 = vld [vmem:[%s198_s30 + $0x10] sm:$0xff] (%p791_p3)  ;;  %s196_s5 = scalar_lea.vmem (%p791_p3), [#allocation2], %s648_s27 }
  0x12   : > { %v234_v2 = vld [vmem:[%s198_s30 + $0x20] sm:$0xff] (%p791_p3)  ;;  %231 = vst [vmem:[%s196_s5] sm:$0xff] (%p791_p3), %v230_v0  ;;  %233 = vst [vmem:[%s196_s5 + $0x8] sm:$0xff] (%p791_p3), %v232_v1 }
  0x13   : > { %235 = vst [vmem:[%s196_s5 + $0x10] sm:$0xff] (%p791_p3), %v234_v2 }
  0x15 PF: > { %254 = sbr.rel (!%p791_p3) target bundleno = 28 (0x1c), region = 66  ;;  %s256_s6 = sand.u32 (%p791_p3), 1, %s720_s16  }
  0x16   : > { %s631_s7 = sshll.u32 (%p791_p3), %s728_s18, 3  ;;  %s649_s8 = smul.u32 (%p791_p3), 24, %s256_s6 }
  0x17   : > { %s260_s11 = scalar_lea.vmem (%p791_p3), %s853_s3, %s631_s7 }
  0x18   : > { %v292_v3 = vld [vmem:[%s260_s11] sm:$0xff] (%p791_p3)  ;;  %v294_v4 = vld [vmem:[%s260_s11 + $0x10] sm:$0xff] (%p791_p3)  ;;  %s258_s12 = scalar_lea.vmem (%p791_p3), [#allocation3], %s649_s8 }
  0x19   : > { %v296_v5 = vld [vmem:[%s260_s11 + $0x20] sm:$0xff] (%p791_p3)  ;;  %293 = vst [vmem:[%s258_s12] sm:$0xff] (%p791_p3), %v292_v3  ;;  %295 = vst [vmem:[%s258_s12 + $0x8] sm:$0xff] (%p791_p3), %v294_v4 }
  0x1a   : > { %297 = vst [vmem:[%s258_s12 + $0x10] sm:$0xff] (%p791_p3), %v296_v5 }
  0x1c PF: > { %p632_p6 = scmp.ge.s32.totalorder %s732_s19, 1  ;;  %p302_p7 = scmp.lt.s32.totalorder %s732_s19, 3 }
  0x1e   : > { %p303_p8 = pnand %p632_p6, %p302_p7 }
  0x1f   : > { %s309_s13 = sand.u32 (!%p303_p8), 1, %s716_s15   ;;  %v734_v6 = vmov (!%p303_p8), 0   ;;  %p368_p9 = scmp.lt.s32.totalorder (!%p303_p8), %s724_s17, 1 }
  0x20   : > { %306 = sbr.rel (%p303_p8) target bundleno = 182 (0xb6), region = 104  ;;  %693 = vset.pattern.permute.xlu1 (!%p303_p8), %v734_v6  ;;  %692 = vset.pattern.permute.xlu0 (!%p303_p8), %v734_v6 }
  0x21   : > { %s650_s14 = smul.u32 (!%p303_p8), 24, %s309_s13 }
  0x23   : > { %s311_s21 = scalar_lea.vmem (!%p303_p8), [#allocation2], %s650_s14  ;;  %s318_s22 = scalar_lea.vmem (!%p303_p8), [#allocation3], %s650_s14 }
  0x24   : > { %v639_v7 = vld [vmem:[%s311_s21 + $0x8] sm:$0xff] (!%p303_p8)  ;;  %v401_v8 = vld [vmem:[%s311_s21] sm:$0xff] (!%p303_p8)  ;;  %v640_v9 = vld [vmem:[%s311_s21 + $0x10] sm:$0xff] (!%p303_p8) }
  0x25   : > { %437 = vperm.xlu1 (!%p303_p8), %693, %v639_v7   ;;  %404 = vperm.xlu0 (!%p303_p8), %692, %v401_v8   ;;  %v419_v10 = vld [vmem:[%s318_s22] sm:$0xff] (!%p303_p8)  ;;  %v642_v11 = vld [vmem:[%s318_s22 + $0x10] sm:$0xff] (!%p303_p8)  ;;  %v641_v12 = vld [vmem:[%s318_s22 + $0x8] sm:$0xff] (!%p303_p8) }
  0x27   : > { %s863_s17 = smov (!%p368_p9, %s724_s17), 1 }
  0x28   : > { %s821_s15 = sshll.u32 %s863_s17, 5 }
  0x29   : > { %448 = vperm.xlu1 %693, %v640_v9   ;;  %422 = vperm.xlu0 %692, %v419_v10   ;;  %s375_s26 = scalar_lea.vmem %s850_s0, %s821_s15  ;;  %s385_s29 = scalar_lea.vmem %s852_s2, %s821_s15 }
  0x2a   : > { %v397_v13 = vld [vmem:[%s375_s26] sm:$0xff]  ;;  %v398_v14 = vld [vmem:[%s375_s26 + $0x8] sm:$0xff]  ;;  %v399_v15 = vld [vmem:[%s375_s26 + $0x10] sm:$0xff]  ;;  %s395_s5 = scalar_lea.vmem %s854_s4, %s821_s15 }
  0x2b   : > { %v400_v16 = vld [vmem:[%s375_s26 + $0x18] sm:$0xff]  ;;  %v415_v23 = vld [vmem:[%s385_s29] sm:$0xff]  ;;  %v416_v24 = vld [vmem:[%s385_s29 + $0x8] sm:$0xff] }
  0x2c   : > { %v417_v29 = vld [vmem:[%s385_s29 + $0x10] sm:$0xff]  ;;  %v418_v30 = vld [vmem:[%s385_s29 + $0x18] sm:$0xff] }
  0x2d   : > { %474 = vperm.xlu1 %693, %v642_v11   ;;  %459 = vperm.xlu0 %692, %v641_v12  }
  0xa4   : > { %v405_v17 = vpop.permute.xlu0 %404  ;;  %v438_v18 = vpop.permute.xlu1 %437 }
  0xa5   : > { %v407_v19 = vadd.f32 %v405_v17, %v397_v13  ;;  %v408_v20 = vadd.f32 %v405_v17, %v398_v14  ;;  %v409_v21 = vadd.f32 %v405_v17, %v399_v15  ;;  %v410_v22 = vadd.f32 %v405_v17, %v400_v16 }
  0xa7   : > { %v411_v25 = vmax.f32 %v407_v19, 0.0  ;;  %v412_v26 = vmax.f32 %v408_v20, 0.0  ;;  %v413_v27 = vmax.f32 %v409_v21, 0.0  ;;  %v414_v28 = vmax.f32 %v410_v22, 0.0 }
  0xa8   : > { %v423_v31 = vpop.permute.xlu0 %422  ;;  %v449_v40 = vpop.permute.xlu1 %448 }
  0xa9   : > { %v440_v32 = vmul.f32 %v438_v18, %v411_v25  ;;  %v441_v33 = vmul.f32 %v438_v18, %v412_v26  ;;  %v442_v34 = vmul.f32 %v438_v18, %v413_v27  ;;  %v443_v35 = vmul.f32 %v438_v18, %v414_v28 }
  0xaa   : > { %v425_v36 = vadd.f32 %v423_v31, %v415_v23  ;;  %v426_v37 = vadd.f32 %v423_v31, %v416_v24  ;;  %v427_v38 = vadd.f32 %v423_v31, %v417_v29  ;;  %v428_v39 = vadd.f32 %v423_v31, %v418_v30 }
  0xab   : > { %v451_v46 = vadd.f32 %v449_v40, %v440_v32  ;;  %v452_v47 = vadd.f32 %v449_v40, %v441_v33  ;;  %v453_v48 = vadd.f32 %v449_v40, %v442_v34  ;;  %v454_v49 = vadd.f32 %v449_v40, %v443_v35 }
  0xac   : > { %v429_v41 = vmax.f32 %v425_v36, 0.0  ;;  %v430_v42 = vmax.f32 %v426_v37, 0.0  ;;  %v431_v43 = vmax.f32 %v427_v38, 0.0  ;;  %v432_v44 = vmax.f32 %v428_v39, 0.0  ;;  %v460_v45 = vpop.permute.xlu0 %459  ;;  %v475_v58 = vpop.permute.xlu1 %474 }
  0xae   : > { %v462_v50 = vmul.f32 %v460_v45, %v429_v41  ;;  %v463_v51 = vmul.f32 %v460_v45, %v430_v42  ;;  %v464_v52 = vmul.f32 %v460_v45, %v431_v43  ;;  %v465_v53 = vmul.f32 %v460_v45, %v432_v44 }
  0xb0   : > { %v466_v54 = vadd.f32 %v462_v50, %v451_v46  ;;  %v467_v55 = vadd.f32 %v463_v51, %v452_v47  ;;  %v468_v56 = vadd.f32 %v464_v52, %v453_v48  ;;  %v469_v57 = vadd.f32 %v465_v53, %v454_v49 }
  0xb2   : > { %v477_v59 = vadd.f32 %v475_v58, %v466_v54  ;;  %v478_v60 = vadd.f32 %v475_v58, %v467_v55  ;;  %v479_v61 = vadd.f32 %v475_v58, %v468_v56  ;;  %v480_v62 = vadd.f32 %v475_v58, %v469_v57 }
  0xb4   : > { %481 = vst [vmem:[%s395_s5] sm:$0xff] %v477_v59  ;;  %482 = vst [vmem:[%s395_s5 + $0x8] sm:$0xff] %v478_v60 }
  0xb5   : > { %483 = vst [vmem:[%s395_s5 + $0x10] sm:$0xff] %v479_v61  ;;  %484 = vst [vmem:[%s395_s5 + $0x18] sm:$0xff] %v480_v62 }
  0xb6 PF: > { %s14_s19 = sadd.s32 1, %s732_s19   ;;  %s856_s15 = smov %s720_s16 }
  0xb7   : > { %p11_p10 = scmp.ge.s32.totalorder %s14_s19, 4   ;;  %s857_s16 = smov %s799_s24 }
  0xb8   : > { %s858_s17 = smov %s728_s18  ;;  %s859_s18 = smov %s861_s20 }
  0xb9   :  { %13 = sbr.rel (!%p11_p10) target bundleno = 3 (0x3), region = 165 }

</bundles_post_ra>
